<compile_context>
chip_gen: v5e
topology: v5e:2x2
jax: 0.10.0
libtpu: 0.0.40
codegen_flags: <defaults>
</compile_context>

<pallas_src>
import functools
import math

import jax
import jax.numpy as jnp
from jax.experimental import pallas as pl
from jax.experimental.pallas import tpu as pltpu


def _round_up(x, m):
    return (x + m - 1) // m * m


# --------------------------------------------------------------------------
# Kernels
# --------------------------------------------------------------------------

def _euc_linear_resident_kernel(x_ref, w_ref, o_ref, *, scale):
    """Whole weight VMEM-resident: x_ref (tm, K) @ w_ref (K, N) -> o_ref (tm, N)."""
    out = jnp.dot(x_ref[...], w_ref[...], preferred_element_type=jnp.float32)
    if scale != 1.0:            # trace-time branch: no-op mul elided
        out = out * scale
    o_ref[...] = out.astype(o_ref.dtype)


def _euc_linear_tiled_kernel(x_ref, w_ref, o_ref, acc_ref, *, scale):
    """3-D grid (M, N, K): x_ref (tm, tk) @ w_ref (tk, tn), f32 acc over K."""
    k_idx = pl.program_id(2)

    @pl.when(k_idx == 0)
    def _():
        acc_ref[...] = jnp.zeros_like(acc_ref)

    # Fused accumulate so Mosaic can use the MRB in-place accumulate on v7x.
    acc_ref[...] += jnp.dot(x_ref[...], w_ref[...],
                            preferred_element_type=jnp.float32)

    @pl.when(k_idx == pl.num_programs(2) - 1)
    def _():
        out = acc_ref[...]
        if scale != 1.0:        # trace-time branch
            out = out * scale
        o_ref[...] = out.astype(o_ref.dtype)


# --------------------------------------------------------------------------
# Wrapper
# --------------------------------------------------------------------------

def euc_linear(x, weight, *, scale=1.0,
               tm=512, tn=512, tk=512,
               use_bf16_matmul=False,
               weight_resident_bytes=6 * 2**20,
               min_pallas_elems=1 << 20):
    """EucLinear forward: (x @ weight.T) * scale, dropout = identity (eval mode).

    Args:
      x:      (..., in_dim) input.
      weight: (out_dim, in_dim) — PyTorch nn.Linear convention.
      scale:  scalar multiplier (module uses 1.0).
      tm/tn/tk: row / out-feature / reduction tile sizes (aligned & clamped).
      use_bf16_matmul: cast f32 operands to bf16 (wrapper-side, cacheable) and
        accumulate in f32 — faster on v6e/v7x, slightly looser numerics.
      weight_resident_bytes: max weight size for the VMEM-resident fast path.
      min_pallas_elems: below m*out_dim*in_dim of this, fall back to XLA.

    Returns:
      (..., out_dim) output with the same dtype as x.
    """
    # TODO(synk): training-mode dropout (pltpu.prng_random_bits mask) not implemented.
    out_dim, in_dim = weight.shape
    lead_shape = x.shape[:-1]
    m = math.prod(lead_shape) if lead_shape else 1
    out_dtype = x.dtype

    # ---- Small-shape bypass: XLA wins below tile scale (e.g. the 32->16 case).
    if (out_dim < 128 or in_dim < 128 or m < 8
            or m * out_dim * in_dim < min_pallas_elems):
        y = jnp.einsum("...k,nk->...n", x, weight)
        if scale != 1.0:
            y = y * scale
        return y.astype(out_dtype)

    x2d = x.reshape(m, in_dim)

    # ---- Wrapper-side (one-time / cacheable) layout + dtype prep.
    # nn.Linear weights are static across calls: with a jitted caller the
    # transpose and cast are constant-folded; in a real module cache w_t.
    if use_bf16_matmul and x2d.dtype == jnp.float32:
        x2d = x2d.astype(jnp.bfloat16)
    w_t = weight.T                                 # (in_dim, out_dim)
    if w_t.dtype != x2d.dtype:
        w_t = w_t.astype(x2d.dtype)

    x_item = jnp.dtype(x2d.dtype).itemsize
    w_item = jnp.dtype(w_t.dtype).itemsize
    o_item = jnp.dtype(out_dtype).itemsize

    # ---- M tile: sublane-aligned (16 for bf16, 8 for f32), never larger than m.
    sub = 16 if x2d.dtype == jnp.bfloat16 else 8
    if m >= sub:
        tm_eff = max(sub, (min(tm, m) // sub) * sub)
    else:
        tm_eff = 8                                  # minimum legal sublane tile
    grid_m = pl.cdiv(m, tm_eff)

    # ---- Weight-resident fast path sizing (conservative: VMEM-layout-padded dims).
    kp128 = _round_up(in_dim, 128)
    n128 = _round_up(out_dim, 128)
    w_bytes = kp128 * n128 * w_item
    resident_fp = (2 * tm_eff * kp128 * x_item      # double-buffered x tiles
                   + 2 * w_bytes                    # weight buffers
                   + 2 * tm_eff * n128 * o_item)    # double-buffered out tiles
    use_resident = (w_bytes <= weight_resident_bytes
                    and resident_fp <= 24 * 2**20)  # v7x-safe (64 MiB physical)

    if use_resident:
        # Zero-pad K to a lane multiple only if needed (exact: zeros add nothing).
        if kp128 != in_dim:
            x2d = jnp.pad(x2d, ((0, 0), (0, kp128 - in_dim)))
            w_t = jnp.pad(w_t, ((0, kp128 - in_dim), (0, 0)))
        vmem_limit = int(min(max(2 * resident_fp, 16 * 2**20), 40 * 2**20))
        out = pl.pallas_call(
            functools.partial(_euc_linear_resident_kernel, scale=scale),
            out_shape=jax.ShapeDtypeStruct((m, out_dim), out_dtype),
            grid_spec=pltpu.PrefetchScalarGridSpec(
                num_scalar_prefetch=0,
                grid=(grid_m,),
                in_specs=[
                    pl.BlockSpec((tm_eff, kp128), lambda i: (i, 0)),   # x rows
                    pl.BlockSpec((kp128, out_dim), lambda i: (0, 0)),  # resident W
                ],
                out_specs=pl.BlockSpec((tm_eff, out_dim), lambda i: (i, 0)),
            ),
            compiler_params=pltpu.CompilerParams(
                dimension_semantics=("parallel",),
                vmem_limit_bytes=vmem_limit,
            ),
        )(x2d, w_t)
        return out.reshape(lead_shape + (out_dim,))

    # ---- General 3-D tiled path (M, N, K) with f32 VMEM accumulator.
    tn_eff = max(128, (min(tn, out_dim) // 128) * 128)   # <= out_dim, 128-mult
    tk_eff = max(128, (min(tk, in_dim) // 128) * 128)    # <= in_dim, 128-mult
    kp = _round_up(in_dim, tk_eff)
    if kp != in_dim:
        # Only K is padded (required for exact accumulation); M/N stay ragged.
        x2d = jnp.pad(x2d, ((0, 0), (0, kp - in_dim)))
        w_t = jnp.pad(w_t, ((0, kp - in_dim), (0, 0)))

    grid = (grid_m, pl.cdiv(out_dim, tn_eff), kp // tk_eff)

    tiled_fp = (2 * (tm_eff * tk_eff * x_item
                     + tk_eff * tn_eff * w_item
                     + tm_eff * tn_eff * o_item)
                + tm_eff * tn_eff * 4)                    # f32 accumulator
    vmem_limit = int(min(max(2 * tiled_fp, 16 * 2**20), 40 * 2**20))

    out = pl.pallas_call(
        functools.partial(_euc_linear_tiled_kernel, scale=scale),
        out_shape=jax.ShapeDtypeStruct((m, out_dim), out_dtype),
        grid_spec=pltpu.PrefetchScalarGridSpec(
            num_scalar_prefetch=0,
            grid=grid,
            in_specs=[
                pl.BlockSpec((tm_eff, tk_eff), lambda i, j, k: (i, k)),  # x tile
                pl.BlockSpec((tk_eff, tn_eff), lambda i, j, k: (k, j)),  # W tile
            ],
            out_specs=pl.BlockSpec((tm_eff, tn_eff), lambda i, j, k: (i, j)),
            scratch_shapes=[pltpu.VMEM((tm_eff, tn_eff), jnp.float32)],
        ),
        compiler_params=pltpu.CompilerParams(
            dimension_semantics=("parallel", "parallel", "arbitrary"),
            vmem_limit_bytes=vmem_limit,
        ),
    )(x2d, w_t)
    return out.reshape(lead_shape + (out_dim,))


# --------------------------------------------------------------------------
# Demo / correctness checks
# --------------------------------------------------------------------------

if __name__ == "__main__":
    key = jax.random.PRNGKey(0)
    kx, kw, kx2, kw2 = jax.random.split(key, 4)

    # 1) Module-sized tiny shapes (batch=2, seq=8, in_dim=32, out_dim=16).
    #    Below tile scale -> XLA bypass path, exact semantics.
    batch, seq, in_dim, out_dim = 2, 8, 32, 16
    dropout_p = 0.1  # eval-mode dropout is identity
    x = jax.random.normal(kx, (batch, seq, in_dim), dtype=jnp.float32)
    weight = jax.random.normal(kw, (out_dim, in_dim), dtype=jnp.float32) * 0.1
    bias = jnp.zeros((1, out_dim), dtype=jnp.float32)  # unused in forward()
    y = jax.block_until_ready(euc_linear(x, weight, scale=1.0))
    y_ref = jnp.einsum("bsk,nk->bsn", x, weight)
    assert y.shape == (batch, seq, out_dim)
    assert jnp.allclose(y, y_ref, atol=1e-5, rtol=1e-5)

    # 2) Weight-resident Pallas path (ragged M=200, weight held in VMEM once).
    x2 = jax.random.normal(kx2, (2, 100, 256), dtype=jnp.float32)
    w2 = jax.random.normal(kw2, (256, 256), dtype=jnp.float32) * 0.05
    y2 = jax.block_until_ready(euc_linear(x2, w2, scale=1.0))
    y2_ref = jnp.einsum("bsk,nk->bsn", x2, w2)
    assert jnp.allclose(y2, y2_ref, atol=1e-4, rtol=1e-4)

    # 3) Tiled 3-D-grid Pallas path (multiple K steps, ragged M, small tiles).
    x3 = jax.random.normal(kx, (3, 100, 384), dtype=jnp.float32)
    w3 = jax.random.normal(kw, (256, 384), dtype=jnp.float32) * 0.05
    y3 = jax.block_until_ready(
        euc_linear(x3, w3, tm=128, tn=128, tk=128, weight_resident_bytes=0))
    y3_ref = jnp.einsum("bsk,nk->bsn", x3, w3)
    assert jnp.allclose(y3, y3_ref, atol=1e-4, rtol=1e-4)

    # 4) bf16 MXU path (wrapper-side cast, f32 accumulation) — looser tolerance.
    y4 = jax.block_until_ready(euc_linear(x2, w2, use_bf16_matmul=True))
    assert jnp.allclose(y4, y2_ref, atol=5e-2, rtol=5e-2)

    print("KERNEL_OK")
</pallas_src>

<mosaic_0001>
module attributes {stable_mosaic.version = 11 : i64} {
  func.func @_euc_linear_resident_kernel(%arg0: i32, %arg1: memref<200x256xf32, #tpu.memory_space<vmem>>, %arg2: memref<256x256xf32, #tpu.memory_space<vmem>>, %arg3: memref<200x256xf32, #tpu.memory_space<vmem>>) attributes {dimension_semantics = [#tpu.dimension_semantics<parallel>], iteration_bounds = array<i64: 1>, scalar_prefetch = 0 : i64, scratch_operands = 0 : i64, tpu.core_type = #tpu.core_type<tc>, window_params = [{transform_indices = @transform_0, window_bounds = array<i64: 200, 256>}, {pipeline_mode = #tpu.pipeline_mode<synchronous>, transform_indices = @transform_1, window_bounds = array<i64: 256, 256>}, {transform_indices = @transform_2, window_bounds = array<i64: 200, 256>}]} {
    %c0 = arith.constant 0 : index
    %c0_0 = arith.constant 0 : index
    %0 = vector.load %arg1[%c0, %c0_0] : memref<200x256xf32, #tpu.memory_space<vmem>>, vector<200x256xf32>
    %c0_1 = arith.constant 0 : index
    %c0_2 = arith.constant 0 : index
    %1 = vector.load %arg2[%c0_1, %c0_2] : memref<256x256xf32, #tpu.memory_space<vmem>>, vector<256x256xf32>
    %cst = arith.constant dense<0.000000e+00> : vector<200x256xf32>
    %2 = tpu.matmul %0, %1, %cst {dimension_numbers = #tpu.dot_dimension_numbers<[1], [0], [0], [1], [0, 0, 1, 1], [], []>} : vector<200x256xf32>, vector<256x256xf32>, vector<200x256xf32> -> vector<200x256xf32>
    %c0_3 = arith.constant 0 : index
    %c0_4 = arith.constant 0 : index
    %3 = vector.load %arg3[%c0_3, %c0_4] : memref<200x256xf32, #tpu.memory_space<vmem>>, vector<200x256xf32>
    tpu.vector_store %arg3[%c0_3, %c0_4], %2 {strides = array<i32>} : memref<200x256xf32, #tpu.memory_space<vmem>>, vector<200x256xf32>,
    return
  }
  func.func @transform_0(%arg0: i32) -> (i32, i32) {
    %c0_i32 = arith.constant 0 : i32
    %c0_i32_0 = arith.constant 0 : i32
    return %arg0, %c0_i32 : i32, i32
  }
  func.func @transform_1(%arg0: i32) -> (i32, i32) {
    %c0_i32 = arith.constant 0 : i32
    %c0_i32_0 = arith.constant 0 : i32
    %c0_i32_1 = arith.constant 0 : i32
    return %c0_i32, %c0_i32_0 : i32, i32
  }
  func.func @transform_2(%arg0: i32) -> (i32, i32) {
    %c0_i32 = arith.constant 0 : i32
    %c0_i32_0 = arith.constant 0 : i32
    return %arg0, %c0_i32 : i32, i32
  }
}

</mosaic_0001>

<bundles_post_ra>
// kernel: tpu_custom_call.1
= control target key start
LH: loop header
LB: loop body
LE: loop exit
PB: predicated region body
PF: predicated region fallthrough
CT: control target
= control target key end

     0   :  { %7 = vsyncpa [#allocation3], 0  ;;  %s717_s0 = inlined_call_operand.hbm [shape: f32[200,256], index: 0, kind: input, shape index: {}]   ;;  %s718_s1 = inlined_call_operand.hbm [shape: f32[256,256], index: 1, kind: input, shape index: {}]   ;;  %s719_s2 = inlined_call_operand.hbm [shape: f32[200,256], index: 2, kind: output, shape index: {}]  }
   0x1   :  { %8 = vsyncpa [#allocation6], 0 }
   0x2   :  { %9 = vsyncpa [#allocation4], 0  ;;  %s14_s11 = sshll.u32 %s717_s0, 4  ;;  %s679_s12 = smov [#allocation2]   ;;  %s15_s11 = int_to_ptr.hbm [resolvable:$true] %s14_s11 }
   0x3   :  { %s16_s13 = sshll.u32 %s679_s12, 4  ;;  %s27_s16 = sshll.u32 %s718_s1, 4  ;;  %s17_s13 = int_to_ptr.vmem [resolvable:$true] %s16_s13  ;;  %s28_s16 = int_to_ptr.hbm [resolvable:$true] %s27_s16 }
   0x4   :  { %s680_s17 = smov 256   ;;  %s681_s18 = smov 16  }
   0x5   :  { %22 = dma.hbm_to_vmem [thread:$0]  %s15_s11, 6400, %s17_s13, [#allocation3], %s680_s17, %s680_s17, %s681_s18  }
   0x6   :  { %s682_s19 = smov [#allocation5]  }
   0x7   :  { %s29_s20 = sshll.u32 %s682_s19, 4  ;;  %s30_s20 = int_to_ptr.vmem [resolvable:$true] %s29_s20 }
   0x8   :  { %35 = dma.hbm_to_vmem [thread:$0]  %s28_s16, 8192, %s30_s20, [#allocation6], %s680_s17, %s680_s17, %s681_s18  }
   0x9   :  { %673 = dma.done.wait [#allocation3], 6400  }
   0xa   :  { %674 = vsyncadd [#allocation3], 4294960896 }
   0xb   :  { %675 = dma.done.wait [#allocation6], 8192  }
   0xc   :  { %676 = vsyncadd [#allocation6], 4294959104  ;;  %v125_v0 = vld [vmem:[#allocation5 + $0xf8] sm:$0xff]  ;;  %v123_v2 = vld [vmem:[#allocation5 + $0xe8] sm:$0xff]  ;;  %s683_s0 = smov [#allocation7]   ;;  %s582_s23 = sshll.u32 %s719_s2, 4  ;;  %s583_s23 = int_to_ptr.hbm [resolvable:$true] %s582_s23 }
   0xd   :  { %v157_v1 = vld [vmem:[#allocation5 + $0x1f8] sm:$0xff]  ;;  %342 = vmatpush.msra.mxu2 %v125_v0  ;;  %v155_v3 = vld [vmem:[#allocation5 + $0x1e8] sm:$0xff]  ;;  %v124_v6 = vld [vmem:[#allocation5 + $0xf0] sm:$0xff]  ;;  %s580_s1 = sshll.u32 %s683_s0, 4  ;;  %s581_s1 = int_to_ptr.vmem [resolvable:$true] %s580_s1 }
   0xe   :  { %434 = vmatpush.msra.mxu3 %v157_v1  ;;  %v121_v4 = vld [vmem:[#allocation5 + $0xd8] sm:$0xff]  ;;  %v156_v7 = vld [vmem:[#allocation5 + $0x1f0] sm:$0xff]  ;;  %v122_v8 = vld [vmem:[#allocation5 + $0xe0] sm:$0xff]  ;;  %158 = vmatpush.msra.mxu0 %v124_v6 }
   0xf   :  { %v153_v5 = vld [vmem:[#allocation5 + $0x1d8] sm:$0xff]  ;;  %343 = vmatpush.msra.mxu2 %v123_v2  ;;  %v154_v9 = vld [vmem:[#allocation5 + $0x1e0] sm:$0xff]  ;;  %250 = vmatpush.msra.mxu1 %v156_v7  ;;  %v119_v10 = vld [vmem:[#allocation5 + $0xc8] sm:$0xff] }
  0x10   :  { %435 = vmatpush.msra.mxu3 %v155_v3  ;;  %v151_v11 = vld [vmem:[#allocation5 + $0x1c8] sm:$0xff]  ;;  %v120_v12 = vld [vmem:[#allocation5 + $0xd0] sm:$0xff]  ;;  %159 = vmatpush.msra.mxu0 %v122_v8  ;;  %v117_v14 = vld [vmem:[#allocation5 + $0xb8] sm:$0xff] }
  0x11   :  { %344 = vmatpush.msra.mxu2 %v121_v4  ;;  %v152_v13 = vld [vmem:[#allocation5 + $0x1d0] sm:$0xff]  ;;  %251 = vmatpush.msra.mxu1 %v154_v9  ;;  %v149_v15 = vld [vmem:[#allocation5 + $0x1b8] sm:$0xff]  ;;  %v118_v16 = vld [vmem:[#allocation5 + $0xc0] sm:$0xff] }
  0x12   :  { %436 = vmatpush.msra.mxu3 %v153_v5  ;;  %v150_v17 = vld [vmem:[#allocation5 + $0x1c0] sm:$0xff]  ;;  %160 = vmatpush.msra.mxu0 %v120_v12  ;;  %v115_v18 = vld [vmem:[#allocation5 + $0xa8] sm:$0xff]  ;;  %v116_v20 = vld [vmem:[#allocation5 + $0xb0] sm:$0xff] }
  0x13   :  { %345 = vmatpush.msra.mxu2 %v119_v10  ;;  %252 = vmatpush.msra.mxu1 %v152_v13  ;;  %v147_v19 = vld [vmem:[#allocation5 + $0x1a8] sm:$0xff]  ;;  %v148_v21 = vld [vmem:[#allocation5 + $0x1b0] sm:$0xff]  ;;  %v113_v22 = vld [vmem:[#allocation5 + $0x98] sm:$0xff] }
  0x14   :  { %437 = vmatpush.msra.mxu3 %v151_v11  ;;  %161 = vmatpush.msra.mxu0 %v118_v16  ;;  %v145_v23 = vld [vmem:[#allocation5 + $0x198] sm:$0xff]  ;;  %v114_v24 = vld [vmem:[#allocation5 + $0xa0] sm:$0xff]  ;;  %v111_v26 = vld [vmem:[#allocation5 + $0x88] sm:$0xff] }
  0x15   :  { %346 = vmatpush.msra.mxu2 %v117_v14  ;;  %253 = vmatpush.msra.mxu1 %v150_v17  ;;  %v146_v25 = vld [vmem:[#allocation5 + $0x1a0] sm:$0xff]  ;;  %v143_v27 = vld [vmem:[#allocation5 + $0x188] sm:$0xff]  ;;  %v112_v28 = vld [vmem:[#allocation5 + $0x90] sm:$0xff] }
  0x16   :  { %438 = vmatpush.msra.mxu3 %v149_v15  ;;  %162 = vmatpush.msra.mxu0 %v116_v20  ;;  %v144_v29 = vld [vmem:[#allocation5 + $0x190] sm:$0xff]  ;;  %v109_v30 = vld [vmem:[#allocation5 + $0x78] sm:$0xff]  ;;  %v110_v32 = vld [vmem:[#allocation5 + $0x80] sm:$0xff] }
  0x17   :  { %347 = vmatpush.msra.mxu2 %v115_v18  ;;  %254 = vmatpush.msra.mxu1 %v148_v21  ;;  %v141_v31 = vld [vmem:[#allocation5 + $0x178] sm:$0xff]  ;;  %v142_v33 = vld [vmem:[#allocation5 + $0x180] sm:$0xff]  ;;  %v107_v34 = vld [vmem:[#allocation5 + $0x68] sm:$0xff] }
  0x18   :  { %439 = vmatpush.msra.mxu3 %v147_v19  ;;  %163 = vmatpush.msra.mxu0 %v114_v24  ;;  %v139_v35 = vld [vmem:[#allocation5 + $0x168] sm:$0xff]  ;;  %v108_v36 = vld [vmem:[#allocation5 + $0x70] sm:$0xff]  ;;  %v105_v38 = vld [vmem:[#allocation5 + $0x58] sm:$0xff] }
  0x19   :  { %348 = vmatpush.msra.mxu2 %v113_v22  ;;  %255 = vmatpush.msra.mxu1 %v146_v25  ;;  %v140_v37 = vld [vmem:[#allocation5 + $0x170] sm:$0xff]  ;;  %v137_v39 = vld [vmem:[#allocation5 + $0x158] sm:$0xff]  ;;  %v106_v40 = vld [vmem:[#allocation5 + $0x60] sm:$0xff] }
  0x1a   :  { %440 = vmatpush.msra.mxu3 %v145_v23  ;;  %164 = vmatpush.msra.mxu0 %v112_v28  ;;  %v138_v41 = vld [vmem:[#allocation5 + $0x160] sm:$0xff]  ;;  %v103_v42 = vld [vmem:[#allocation5 + $0x48] sm:$0xff]  ;;  %v104_v44 = vld [vmem:[#allocation5 + $0x50] sm:$0xff] }
  0x1b   :  { %349 = vmatpush.msra.mxu2 %v111_v26  ;;  %256 = vmatpush.msra.mxu1 %v144_v29  ;;  %v135_v43 = vld [vmem:[#allocation5 + $0x148] sm:$0xff]  ;;  %v136_v45 = vld [vmem:[#allocation5 + $0x150] sm:$0xff]  ;;  %v101_v46 = vld [vmem:[#allocation5 + $0x38] sm:$0xff] }
  0x1c   :  { %441 = vmatpush.msra.mxu3 %v143_v27  ;;  %165 = vmatpush.msra.mxu0 %v110_v32  ;;  %v133_v47 = vld [vmem:[#allocation5 + $0x138] sm:$0xff]  ;;  %v102_v48 = vld [vmem:[#allocation5 + $0x40] sm:$0xff]  ;;  %v99_v50 = vld [vmem:[#allocation5 + $0x28] sm:$0xff] }
  0x1d   :  { %350 = vmatpush.msra.mxu2 %v109_v30  ;;  %257 = vmatpush.msra.mxu1 %v142_v33  ;;  %v134_v49 = vld [vmem:[#allocation5 + $0x140] sm:$0xff]  ;;  %v131_v51 = vld [vmem:[#allocation5 + $0x128] sm:$0xff]  ;;  %v100_v52 = vld [vmem:[#allocation5 + $0x30] sm:$0xff] }
  0x1e   :  { %442 = vmatpush.msra.mxu3 %v141_v31  ;;  %166 = vmatpush.msra.mxu0 %v108_v36  ;;  %v132_v53 = vld [vmem:[#allocation5 + $0x130] sm:$0xff]  ;;  %v97_v54 = vld [vmem:[#allocation5 + $0x18] sm:$0xff]  ;;  %v98_v56 = vld [vmem:[#allocation5 + $0x20] sm:$0xff] }
  0x1f   :  { %351 = vmatpush.msra.mxu2 %v107_v34  ;;  %258 = vmatpush.msra.mxu1 %v140_v37  ;;  %v129_v55 = vld [vmem:[#allocation5 + $0x118] sm:$0xff]  ;;  %v130_v57 = vld [vmem:[#allocation5 + $0x120] sm:$0xff]  ;;  %v95_v58 = vld [vmem:[#allocation5 + $0x8] sm:$0xff] }
  0x20   :  { %443 = vmatpush.msra.mxu3 %v139_v35  ;;  %167 = vmatpush.msra.mxu0 %v106_v40  ;;  %v127_v59 = vld [vmem:[#allocation5 + $0x108] sm:$0xff]  ;;  %v44_v60 = vld [vmem:[#allocation2] sm:$0xff]  ;;  %v45_v61 = vld [vmem:[#allocation2 + $0x8] sm:$0xff] }
  0x21   :  { %352 = vmatpush.msra.mxu2 %v105_v38  ;;  %259 = vmatpush.msra.mxu1 %v138_v41  ;;  %v96_v62 = vld [vmem:[#allocation5 + $0x10] sm:$0xff]  ;;  %v94_v0 = vld [vmem:[#allocation5] sm:$0xff]  ;;  %v47_v3 = vld [vmem:[#allocation2 + $0x18] sm:$0xff] }
  0x22   :  { %444 = vmatpush.msra.mxu3 %v137_v39  ;;  %168 = vmatpush.msra.mxu0 %v104_v44  ;;  %v128_v63 = vld [vmem:[#allocation5 + $0x110] sm:$0xff]  ;;  %v126_v1 = vld [vmem:[#allocation5 + $0x100] sm:$0xff]  ;;  %v49_v5 = vld [vmem:[#allocation2 + $0x28] sm:$0xff] }
  0x23   :  { %353 = vmatpush.msra.mxu2 %v103_v42  ;;  %260 = vmatpush.msra.mxu1 %v136_v45  ;;  %v46_v2 = vld [vmem:[#allocation2 + $0x10] sm:$0xff]  ;;  %v48_v4 = vld [vmem:[#allocation2 + $0x20] sm:$0xff]  ;;  %v51_v7 = vld [vmem:[#allocation2 + $0x38] sm:$0xff] }
  0x24   :  { %445 = vmatpush.msra.mxu3 %v135_v43  ;;  %169 = vmatpush.msra.mxu0 %v102_v48  ;;  %v50_v6 = vld [vmem:[#allocation2 + $0x30] sm:$0xff]  ;;  %v52_v8 = vld [vmem:[#allocation2 + $0x40] sm:$0xff]  ;;  %v53_v9 = vld [vmem:[#allocation2 + $0x48] sm:$0xff] }
  0x25   :  { %354 = vmatpush.msra.mxu2 %v101_v46  ;;  %261 = vmatpush.msra.mxu1 %v134_v49  ;;  %v54_v10 = vld [vmem:[#allocation2 + $0x50] sm:$0xff]  ;;  %v55_v11 = vld [vmem:[#allocation2 + $0x58] sm:$0xff]  ;;  %v56_v12 = vld [vmem:[#allocation2 + $0x60] sm:$0xff] }
  0x26   :  { %446 = vmatpush.msra.mxu3 %v133_v47  ;;  %170 = vmatpush.msra.mxu0 %v100_v52  ;;  %v57_v13 = vld [vmem:[#allocation2 + $0x68] sm:$0xff]  ;;  %v58_v14 = vld [vmem:[#allocation2 + $0x70] sm:$0xff]  ;;  %v59_v15 = vld [vmem:[#allocation2 + $0x78] sm:$0xff] }
  0x27   :  { %355 = vmatpush.msra.mxu2 %v99_v50  ;;  %262 = vmatpush.msra.mxu1 %v132_v53  ;;  %v60_v16 = vld [vmem:[#allocation2 + $0x80] sm:$0xff]  ;;  %v61_v17 = vld [vmem:[#allocation2 + $0x88] sm:$0xff]  ;;  %v62_v18 = vld [vmem:[#allocation2 + $0x90] sm:$0xff] }
  0x28   :  { %447 = vmatpush.msra.mxu3 %v131_v51  ;;  %171 = vmatpush.msra.mxu0 %v98_v56  ;;  %v63_v19 = vld [vmem:[#allocation2 + $0x98] sm:$0xff]  ;;  %v64_v20 = vld [vmem:[#allocation2 + $0xa0] sm:$0xff]  ;;  %v65_v21 = vld [vmem:[#allocation2 + $0xa8] sm:$0xff] }
  0x29   :  { %356 = vmatpush.msra.mxu2 %v97_v54  ;;  %263 = vmatpush.msra.mxu1 %v130_v57  ;;  %v66_v22 = vld [vmem:[#allocation2 + $0xb0] sm:$0xff]  ;;  %v67_v23 = vld [vmem:[#allocation2 + $0xb8] sm:$0xff]  ;;  %v68_v24 = vld [vmem:[#allocation2 + $0xc0] sm:$0xff] }
  0x2a   :  { %448 = vmatpush.msra.mxu3 %v129_v55  ;;  %172 = vmatpush.msra.mxu0 %v96_v62  ;;  %v69_v25 = vld [vmem:[#allocation2 + $0xc8] sm:$0xff]  ;;  %v70_v26 = vld [vmem:[#allocation2 + $0xd0] sm:$0xff]  ;;  %v71_v27 = vld [vmem:[#allocation2 + $0xd8] sm:$0xff] }
  0x2b   :  { %357 = vmatpush.msra.mxu2 %v95_v58  ;;  %264 = vmatpush.msra.mxu1 %v128_v63  ;;  %v72_v28 = vld [vmem:[#allocation2 + $0xe0] sm:$0xff]  ;;  %v73_v29 = vld [vmem:[#allocation2 + $0xe8] sm:$0xff]  ;;  %v74_v30 = vld [vmem:[#allocation2 + $0xf0] sm:$0xff] }
  0x2c   :  { %449 = vmatpush.msra.mxu3 %v127_v59  ;;  %358 = vmatmul.f32.vlgmr.msra.gmra.mxu2 %v44_v60  ;;  %v75_v31 = vld [vmem:[#allocation2 + $0xf8] sm:$0xff]  ;;  %v76_v32 = vld [vmem:[#allocation2 + $0x100] sm:$0xff]  ;;  %v77_v33 = vld [vmem:[#allocation2 + $0x108] sm:$0xff] }
  0x2d   :  { %450 = vmatmul.f32.vlgmr.msra.gmra.mxu3 %v45_v61  ;;  %173 = vmatpush.msra.mxu0 %v94_v0  ;;  %v78_v40 = vld [vmem:[#allocation2 + $0x110] sm:$0xff]  ;;  %v79_v41 = vld [vmem:[#allocation2 + $0x118] sm:$0xff]  ;;  %v80_v48 = vld [vmem:[#allocation2 + $0x120] sm:$0xff] }
  0x2e   :  { %265 = vmatpush.msra.mxu1 %v126_v1  ;;  %174 = vmatmul.f32.vlgmr.msra.gmra.mxu0 %v44_v60  ;;  %v81_v49 = vld [vmem:[#allocation2 + $0x128] sm:$0xff]  ;;  %v82_v56 = vld [vmem:[#allocation2 + $0x130] sm:$0xff]  ;;  %v83_v57 = vld [vmem:[#allocation2 + $0x138] sm:$0xff] }
  0x2f   :  { %266 = vmatmul.f32.vlgmr.msra.gmra.mxu1 %v45_v61  ;;  %v84_v0 = vld [vmem:[#allocation2 + $0x140] sm:$0xff]  ;;  %v85_v1 = vld [vmem:[#allocation2 + $0x148] sm:$0xff] }
  0x34   :  { %361 = vmatmul.f32.gmra.mxu2 %v46_v2 }
  0x35   :  { %453 = vmatmul.f32.gmra.mxu3 %v47_v3 }
  0x36   :  { %177 = vmatmul.f32.gmra.mxu0 %v46_v2 }
  0x37   :  { %269 = vmatmul.f32.gmra.mxu1 %v47_v3 }
  0x3c   :  { %364 = vmatmul.f32.gmra.mxu2 %v48_v4 }
  0x3d   :  { %456 = vmatmul.f32.gmra.mxu3 %v49_v5 }
  0x3e   :  { %180 = vmatmul.f32.gmra.mxu0 %v48_v4 }
  0x3f   :  { %272 = vmatmul.f32.gmra.mxu1 %v49_v5 }
  0x44   :  { %367 = vmatmul.f32.gmra.mxu2 %v50_v6 }
  0x45   :  { %459 = vmatmul.f32.gmra.mxu3 %v51_v7 }
  0x46   :  { %183 = vmatmul.f32.gmra.mxu0 %v50_v6 }
  0x47   :  { %275 = vmatmul.f32.gmra.mxu1 %v51_v7 }
  0x4c   :  { %370 = vmatmul.f32.gmra.mxu2 %v52_v8 }
  0x4d   :  { %462 = vmatmul.f32.gmra.mxu3 %v53_v9 }
  0x4e   :  { %186 = vmatmul.f32.gmra.mxu0 %v52_v8  ;;  %v86_v8 = vld [vmem:[#allocation2 + $0x150] sm:$0xff] }
  0x4f   :  { %278 = vmatmul.f32.gmra.mxu1 %v53_v9  ;;  %v87_v9 = vld [vmem:[#allocation2 + $0x158] sm:$0xff] }
  0x54   :  { %373 = vmatmul.f32.gmra.mxu2 %v54_v10 }
  0x55   :  { %465 = vmatmul.f32.gmra.mxu3 %v55_v11 }
  0x56   :  { %189 = vmatmul.f32.gmra.mxu0 %v54_v10 }
  0x57   :  { %281 = vmatmul.f32.gmra.mxu1 %v55_v11 }
  0x5c   :  { %376 = vmatmul.f32.gmra.mxu2 %v56_v12 }
  0x5d   :  { %468 = vmatmul.f32.gmra.mxu3 %v57_v13 }
  0x5e   :  { %192 = vmatmul.f32.gmra.mxu0 %v56_v12 }
  0x5f   :  { %284 = vmatmul.f32.gmra.mxu1 %v57_v13 }
  0x64   :  { %379 = vmatmul.f32.gmra.mxu2 %v58_v14 }
  0x65   :  { %471 = vmatmul.f32.gmra.mxu3 %v59_v15 }
  0x66   :  { %195 = vmatmul.f32.gmra.mxu0 %v58_v14 }
  0x67   :  { %287 = vmatmul.f32.gmra.mxu1 %v59_v15 }
  0x6c   :  { %382 = vmatmul.f32.gmra.mxu2 %v60_v16 }
  0x6d   :  { %474 = vmatmul.f32.gmra.mxu3 %v61_v17 }
  0x6e   :  { %198 = vmatmul.f32.gmra.mxu0 %v60_v16  ;;  %v88_v16 = vld [vmem:[#allocation2 + $0x160] sm:$0xff] }
  0x6f   :  { %290 = vmatmul.f32.gmra.mxu1 %v61_v17  ;;  %v89_v17 = vld [vmem:[#allocation2 + $0x168] sm:$0xff] }
  0x74   :  { %385 = vmatmul.f32.gmra.mxu2 %v62_v18 }
  0x75   :  { %477 = vmatmul.f32.gmra.mxu3 %v63_v19 }
  0x76   :  { %201 = vmatmul.f32.gmra.mxu0 %v62_v18 }
  0x77   :  { %293 = vmatmul.f32.gmra.mxu1 %v63_v19 }
  0x7c   :  { %388 = vmatmul.f32.gmra.mxu2 %v64_v20 }
  0x7d   :  { %480 = vmatmul.f32.gmra.mxu3 %v65_v21 }
  0x7e   :  { %204 = vmatmul.f32.gmra.mxu0 %v64_v20 }
  0x7f   :  { %296 = vmatmul.f32.gmra.mxu1 %v65_v21 }
  0x84   :  { %391 = vmatmul.f32.gmra.mxu2 %v66_v22 }
  0x85   :  { %483 = vmatmul.f32.gmra.mxu3 %v67_v23 }
  0x86   :  { %207 = vmatmul.f32.gmra.mxu0 %v66_v22 }
  0x87   :  { %299 = vmatmul.f32.gmra.mxu1 %v67_v23 }
  0x8c   :  { %394 = vmatmul.f32.gmra.mxu2 %v68_v24 }
  0x8d   :  { %486 = vmatmul.f32.gmra.mxu3 %v69_v25 }
  0x8e   :  { %210 = vmatmul.f32.gmra.mxu0 %v68_v24  ;;  %v90_v24 = vld [vmem:[#allocation2 + $0x170] sm:$0xff] }
  0x8f   :  { %302 = vmatmul.f32.gmra.mxu1 %v69_v25  ;;  %v91_v25 = vld [vmem:[#allocation2 + $0x178] sm:$0xff] }
  0x94   :  { %397 = vmatmul.f32.gmra.mxu2 %v70_v26 }
  0x95   :  { %489 = vmatmul.f32.gmra.mxu3 %v71_v27 }
  0x96   :  { %213 = vmatmul.f32.gmra.mxu0 %v70_v26 }
  0x97   :  { %305 = vmatmul.f32.gmra.mxu1 %v71_v27 }
  0x9c   :  { %400 = vmatmul.f32.gmra.mxu2 %v72_v28 }
  0x9d   :  { %492 = vmatmul.f32.gmra.mxu3 %v73_v29 }
  0x9e   :  { %216 = vmatmul.f32.gmra.mxu0 %v72_v28 }
  0x9f   :  { %308 = vmatmul.f32.gmra.mxu1 %v73_v29 }
  0xa4   :  { %403 = vmatmul.f32.gmra.mxu2 %v74_v30 }
  0xa5   :  { %495 = vmatmul.f32.gmra.mxu3 %v75_v31 }
  0xa6   :  { %219 = vmatmul.f32.gmra.mxu0 %v74_v30 }
  0xa7   :  { %311 = vmatmul.f32.gmra.mxu1 %v75_v31 }
  0xab   :  { %v175_v34 = vpop.f32.mrf.mxu0 }
  0xac   :  { %406 = vmatmul.f32.gmra.mxu2 %v76_v32  ;;  %v267_v35 = vpop.f32.mrf.mxu1 }
  0xad   :  { %498 = vmatmul.f32.gmra.mxu3 %v77_v33  ;;  %v268_v36 = vadd.f32 %v267_v35, %v175_v34 }
  0xae   :  { %222 = vmatmul.f32.gmra.mxu0 %v76_v32  ;;  %v92_v32 = vld [vmem:[#allocation2 + $0x180] sm:$0xff] }
  0xaf   :  { %v359_v37 = vpop.f32.mrf.mxu2  ;;  %526 = vst [vmem:[#allocation7] sm:$0xff] %v268_v36  ;;  %314 = vmatmul.f32.gmra.mxu1 %v77_v33  ;;  %v93_v33 = vld [vmem:[#allocation2 + $0x188] sm:$0xff] }
  0xb0   :  { %v451_v38 = vpop.f32.mrf.mxu3 }
  0xb1   :  { %v452_v39 = vadd.f32 %v451_v38, %v359_v37 }
  0xb3   :  { %527 = vst [vmem:[#allocation7 + $0x8] sm:$0xff] %v452_v39  ;;  %v178_v42 = vpop.f32.mrf.mxu0 }
  0xb4   :  { %409 = vmatmul.f32.gmra.mxu2 %v78_v40  ;;  %v270_v43 = vpop.f32.mrf.mxu1 }
  0xb5   :  { %501 = vmatmul.f32.gmra.mxu3 %v79_v41  ;;  %v271_v44 = vadd.f32 %v270_v43, %v178_v42 }
  0xb6   :  { %225 = vmatmul.f32.gmra.mxu0 %v78_v40 }
  0xb7   :  { %v362_v45 = vpop.f32.mrf.mxu2  ;;  %528 = vst [vmem:[#allocation7 + $0x10] sm:$0xff] %v271_v44  ;;  %317 = vmatmul.f32.gmra.mxu1 %v79_v41 }
  0xb8   :  { %v454_v46 = vpop.f32.mrf.mxu3 }
  0xb9   :  { %v455_v47 = vadd.f32 %v454_v46, %v362_v45 }
  0xbb   :  { %529 = vst [vmem:[#allocation7 + $0x18] sm:$0xff] %v455_v47  ;;  %v181_v50 = vpop.f32.mrf.mxu0 }
  0xbc   :  { %412 = vmatmul.f32.gmra.mxu2 %v80_v48  ;;  %v273_v51 = vpop.f32.mrf.mxu1 }
  0xbd   :  { %504 = vmatmul.f32.gmra.mxu3 %v81_v49  ;;  %v274_v52 = vadd.f32 %v273_v51, %v181_v50 }
  0xbe   :  { %228 = vmatmul.f32.gmra.mxu0 %v80_v48 }
  0xbf   :  { %v365_v53 = vpop.f32.mrf.mxu2  ;;  %530 = vst [vmem:[#allocation7 + $0x20] sm:$0xff] %v274_v52  ;;  %320 = vmatmul.f32.gmra.mxu1 %v81_v49 }
  0xc0   :  { %v457_v54 = vpop.f32.mrf.mxu3 }
  0xc1   :  { %v458_v55 = vadd.f32 %v457_v54, %v365_v53 }
  0xc3   :  { %531 = vst [vmem:[#allocation7 + $0x28] sm:$0xff] %v458_v55  ;;  %v184_v58 = vpop.f32.mrf.mxu0 }
  0xc4   :  { %415 = vmatmul.f32.gmra.mxu2 %v82_v56  ;;  %v276_v59 = vpop.f32.mrf.mxu1 }
  0xc5   :  { %507 = vmatmul.f32.gmra.mxu3 %v83_v57  ;;  %v277_v60 = vadd.f32 %v276_v59, %v184_v58 }
  0xc6   :  { %231 = vmatmul.f32.gmra.mxu0 %v82_v56 }
  0xc7   :  { %v368_v61 = vpop.f32.mrf.mxu2  ;;  %532 = vst [vmem:[#allocation7 + $0x30] sm:$0xff] %v277_v60  ;;  %323 = vmatmul.f32.gmra.mxu1 %v83_v57 }
  0xc8   :  { %v460_v62 = vpop.f32.mrf.mxu3 }
  0xc9   :  { %v461_v63 = vadd.f32 %v460_v62, %v368_v61 }
  0xcb   :  { %533 = vst [vmem:[#allocation7 + $0x38] sm:$0xff] %v461_v63  ;;  %v187_v2 = vpop.f32.mrf.mxu0 }
  0xcc   :  { %418 = vmatmul.f32.gmra.mxu2 %v84_v0  ;;  %v279_v3 = vpop.f32.mrf.mxu1 }
  0xcd   :  { %510 = vmatmul.f32.gmra.mxu3 %v85_v1  ;;  %v280_v4 = vadd.f32 %v279_v3, %v187_v2 }
  0xce   :  { %234 = vmatmul.f32.gmra.mxu0 %v84_v0 }
  0xcf   :  { %v371_v5 = vpop.f32.mrf.mxu2  ;;  %534 = vst [vmem:[#allocation7 + $0x40] sm:$0xff] %v280_v4  ;;  %326 = vmatmul.f32.gmra.mxu1 %v85_v1 }
  0xd0   :  { %v463_v6 = vpop.f32.mrf.mxu3 }
  0xd1   :  { %v464_v7 = vadd.f32 %v463_v6, %v371_v5 }
  0xd3   :  { %535 = vst [vmem:[#allocation7 + $0x48] sm:$0xff] %v464_v7  ;;  %v190_v10 = vpop.f32.mrf.mxu0 }
  0xd4   :  { %421 = vmatmul.f32.gmra.mxu2 %v86_v8  ;;  %v282_v11 = vpop.f32.mrf.mxu1 }
  0xd5   :  { %513 = vmatmul.f32.gmra.mxu3 %v87_v9  ;;  %v283_v12 = vadd.f32 %v282_v11, %v190_v10 }
  0xd6   :  { %237 = vmatmul.f32.gmra.mxu0 %v86_v8 }
  0xd7   :  { %v374_v13 = vpop.f32.mrf.mxu2  ;;  %536 = vst [vmem:[#allocation7 + $0x50] sm:$0xff] %v283_v12  ;;  %329 = vmatmul.f32.gmra.mxu1 %v87_v9 }
  0xd8   :  { %v466_v14 = vpop.f32.mrf.mxu3 }
  0xd9   :  { %v467_v15 = vadd.f32 %v466_v14, %v374_v13 }
  0xdb   :  { %537 = vst [vmem:[#allocation7 + $0x58] sm:$0xff] %v467_v15  ;;  %v193_v18 = vpop.f32.mrf.mxu0 }
  0xdc   :  { %424 = vmatmul.f32.gmra.mxu2 %v88_v16  ;;  %v285_v19 = vpop.f32.mrf.mxu1 }
  0xdd   :  { %516 = vmatmul.f32.gmra.mxu3 %v89_v17  ;;  %v286_v20 = vadd.f32 %v285_v19, %v193_v18 }
  0xde   :  { %240 = vmatmul.f32.gmra.mxu0 %v88_v16 }
  0xdf   :  { %v377_v21 = vpop.f32.mrf.mxu2  ;;  %538 = vst [vmem:[#allocation7 + $0x60] sm:$0xff] %v286_v20  ;;  %332 = vmatmul.f32.gmra.mxu1 %v89_v17 }
  0xe0   :  { %v469_v22 = vpop.f32.mrf.mxu3 }
  0xe1   :  { %v470_v23 = vadd.f32 %v469_v22, %v377_v21 }
  0xe3   :  { %539 = vst [vmem:[#allocation7 + $0x68] sm:$0xff] %v470_v23  ;;  %v196_v26 = vpop.f32.mrf.mxu0 }
  0xe4   :  { %427 = vmatmul.f32.gmra.mxu2 %v90_v24  ;;  %v288_v27 = vpop.f32.mrf.mxu1 }
  0xe5   :  { %519 = vmatmul.f32.gmra.mxu3 %v91_v25  ;;  %v289_v28 = vadd.f32 %v288_v27, %v196_v26 }
  0xe6   :  { %243 = vmatmul.f32.gmra.mxu0 %v90_v24 }
  0xe7   :  { %v380_v29 = vpop.f32.mrf.mxu2  ;;  %540 = vst [vmem:[#allocation7 + $0x70] sm:$0xff] %v289_v28  ;;  %335 = vmatmul.f32.gmra.mxu1 %v91_v25 }
  0xe8   :  { %v472_v30 = vpop.f32.mrf.mxu3 }
  0xe9   :  { %v473_v31 = vadd.f32 %v472_v30, %v380_v29 }
  0xeb   :  { %541 = vst [vmem:[#allocation7 + $0x78] sm:$0xff] %v473_v31  ;;  %v199_v34 = vpop.f32.mrf.mxu0 }
  0xec   :  { %430 = vmatmul.f32.gmra.mxu2 %v92_v32  ;;  %v291_v35 = vpop.f32.mrf.mxu1 }
  0xed   :  { %522 = vmatmul.f32.gmra.mxu3 %v93_v33  ;;  %v292_v36 = vadd.f32 %v291_v35, %v199_v34 }
  0xee   :  { %246 = vmatmul.f32.gmra.mxu0 %v92_v32 }
  0xef   :  { %v383_v37 = vpop.f32.mrf.mxu2  ;;  %542 = vst [vmem:[#allocation7 + $0x80] sm:$0xff] %v292_v36  ;;  %338 = vmatmul.f32.gmra.mxu1 %v93_v33 }
  0xf0   :  { %v475_v38 = vpop.f32.mrf.mxu3 }
  0xf1   :  { %v476_v39 = vadd.f32 %v475_v38, %v383_v37 }
  0xf3   :  { %543 = vst [vmem:[#allocation7 + $0x88] sm:$0xff] %v476_v39  ;;  %v202_v40 = vpop.f32.mrf.mxu0 }
  0xf4   :  { %v294_v41 = vpop.f32.mrf.mxu1 }
  0xf5   :  { %v295_v42 = vadd.f32 %v294_v41, %v202_v40 }
  0xf7   :  { %v386_v43 = vpop.f32.mrf.mxu2  ;;  %544 = vst [vmem:[#allocation7 + $0x90] sm:$0xff] %v295_v42 }
  0xf8   :  { %v478_v44 = vpop.f32.mrf.mxu3 }
  0xf9   :  { %v479_v45 = vadd.f32 %v478_v44, %v386_v43 }
  0xfb   :  { %545 = vst [vmem:[#allocation7 + $0x98] sm:$0xff] %v479_v45  ;;  %v205_v46 = vpop.f32.mrf.mxu0 }
  0xfc   :  { %v297_v47 = vpop.f32.mrf.mxu1 }
  0xfd   :  { %v298_v48 = vadd.f32 %v297_v47, %v205_v46 }
  0xff   :  { %v389_v49 = vpop.f32.mrf.mxu2  ;;  %546 = vst [vmem:[#allocation7 + $0xa0] sm:$0xff] %v298_v48 }
 0x100   :  { %v481_v50 = vpop.f32.mrf.mxu3 }
 0x101   :  { %v482_v51 = vadd.f32 %v481_v50, %v389_v49 }
 0x103   :  { %547 = vst [vmem:[#allocation7 + $0xa8] sm:$0xff] %v482_v51  ;;  %v208_v52 = vpop.f32.mrf.mxu0 }
 0x104   :  { %v300_v53 = vpop.f32.mrf.mxu1 }
 0x105   :  { %v301_v54 = vadd.f32 %v300_v53, %v208_v52 }
 0x107   :  { %v392_v55 = vpop.f32.mrf.mxu2  ;;  %548 = vst [vmem:[#allocation7 + $0xb0] sm:$0xff] %v301_v54 }
 0x108   :  { %v484_v56 = vpop.f32.mrf.mxu3 }
 0x109   :  { %v485_v57 = vadd.f32 %v484_v56, %v392_v55 }
 0x10b   :  { %549 = vst [vmem:[#allocation7 + $0xb8] sm:$0xff] %v485_v57  ;;  %v211_v58 = vpop.f32.mrf.mxu0 }
 0x10c   :  { %v303_v59 = vpop.f32.mrf.mxu1 }
 0x10d   :  { %v304_v60 = vadd.f32 %v303_v59, %v211_v58 }
 0x10f   :  { %v395_v61 = vpop.f32.mrf.mxu2  ;;  %550 = vst [vmem:[#allocation7 + $0xc0] sm:$0xff] %v304_v60 }
 0x110   :  { %v487_v62 = vpop.f32.mrf.mxu3 }
 0x111   :  { %v488_v63 = vadd.f32 %v487_v62, %v395_v61 }
 0x113   :  { %551 = vst [vmem:[#allocation7 + $0xc8] sm:$0xff] %v488_v63  ;;  %v214_v0 = vpop.f32.mrf.mxu0 }
 0x114   :  { %v306_v1 = vpop.f32.mrf.mxu1 }
 0x115   :  { %v307_v2 = vadd.f32 %v306_v1, %v214_v0 }
 0x117   :  { %v398_v3 = vpop.f32.mrf.mxu2  ;;  %552 = vst [vmem:[#allocation7 + $0xd0] sm:$0xff] %v307_v2 }
 0x118   :  { %v490_v4 = vpop.f32.mrf.mxu3 }
 0x119   :  { %v491_v5 = vadd.f32 %v490_v4, %v398_v3 }
 0x11b   :  { %553 = vst [vmem:[#allocation7 + $0xd8] sm:$0xff] %v491_v5  ;;  %v217_v6 = vpop.f32.mrf.mxu0 }
 0x11c   :  { %v309_v7 = vpop.f32.mrf.mxu1 }
 0x11d   :  { %v310_v8 = vadd.f32 %v309_v7, %v217_v6 }
 0x11f   :  { %v401_v9 = vpop.f32.mrf.mxu2  ;;  %554 = vst [vmem:[#allocation7 + $0xe0] sm:$0xff] %v310_v8 }
 0x120   :  { %v493_v10 = vpop.f32.mrf.mxu3 }
 0x121   :  { %v494_v11 = vadd.f32 %v493_v10, %v401_v9 }
 0x123   :  { %555 = vst [vmem:[#allocation7 + $0xe8] sm:$0xff] %v494_v11  ;;  %v220_v12 = vpop.f32.mrf.mxu0 }
 0x124   :  { %v312_v13 = vpop.f32.mrf.mxu1 }
 0x125   :  { %v313_v14 = vadd.f32 %v312_v13, %v220_v12 }
 0x127   :  { %v404_v15 = vpop.f32.mrf.mxu2  ;;  %556 = vst [vmem:[#allocation7 + $0xf0] sm:$0xff] %v313_v14 }
 0x128   :  { %v496_v16 = vpop.f32.mrf.mxu3 }
 0x129   :  { %v497_v17 = vadd.f32 %v496_v16, %v404_v15 }
 0x12b   :  { %557 = vst [vmem:[#allocation7 + $0xf8] sm:$0xff] %v497_v17  ;;  %v223_v18 = vpop.f32.mrf.mxu0 }
 0x12c   :  { %v315_v19 = vpop.f32.mrf.mxu1 }
 0x12d   :  { %v316_v20 = vadd.f32 %v315_v19, %v223_v18 }
 0x12f   :  { %v407_v21 = vpop.f32.mrf.mxu2  ;;  %558 = vst [vmem:[#allocation7 + $0x100] sm:$0xff] %v316_v20 }
 0x130   :  { %v499_v22 = vpop.f32.mrf.mxu3 }
 0x131   :  { %v500_v23 = vadd.f32 %v499_v22, %v407_v21 }
 0x133   :  { %559 = vst [vmem:[#allocation7 + $0x108] sm:$0xff] %v500_v23  ;;  %v226_v24 = vpop.f32.mrf.mxu0 }
 0x134   :  { %v318_v25 = vpop.f32.mrf.mxu1 }
 0x135   :  { %v319_v26 = vadd.f32 %v318_v25, %v226_v24 }
 0x137   :  { %v410_v27 = vpop.f32.mrf.mxu2  ;;  %560 = vst [vmem:[#allocation7 + $0x110] sm:$0xff] %v319_v26 }
 0x138   :  { %v502_v28 = vpop.f32.mrf.mxu3 }
 0x139   :  { %v503_v29 = vadd.f32 %v502_v28, %v410_v27 }
 0x13b   :  { %561 = vst [vmem:[#allocation7 + $0x118] sm:$0xff] %v503_v29  ;;  %v229_v30 = vpop.f32.mrf.mxu0 }
 0x13c   :  { %v321_v31 = vpop.f32.mrf.mxu1 }
 0x13d   :  { %v322_v32 = vadd.f32 %v321_v31, %v229_v30 }
 0x13f   :  { %v413_v33 = vpop.f32.mrf.mxu2  ;;  %562 = vst [vmem:[#allocation7 + $0x120] sm:$0xff] %v322_v32 }
 0x140   :  { %v505_v34 = vpop.f32.mrf.mxu3 }
 0x141   :  { %v506_v35 = vadd.f32 %v505_v34, %v413_v33 }
 0x143   :  { %563 = vst [vmem:[#allocation7 + $0x128] sm:$0xff] %v506_v35  ;;  %v232_v36 = vpop.f32.mrf.mxu0 }
 0x144   :  { %v324_v37 = vpop.f32.mrf.mxu1 }
 0x145   :  { %v325_v38 = vadd.f32 %v324_v37, %v232_v36 }
 0x147   :  { %v416_v39 = vpop.f32.mrf.mxu2  ;;  %564 = vst [vmem:[#allocation7 + $0x130] sm:$0xff] %v325_v38 }
 0x148   :  { %v508_v40 = vpop.f32.mrf.mxu3 }
 0x149   :  { %v509_v41 = vadd.f32 %v508_v40, %v416_v39 }
 0x14b   :  { %565 = vst [vmem:[#allocation7 + $0x138] sm:$0xff] %v509_v41  ;;  %v235_v42 = vpop.f32.mrf.mxu0 }
 0x14c   :  { %v327_v43 = vpop.f32.mrf.mxu1 }
 0x14d   :  { %v328_v44 = vadd.f32 %v327_v43, %v235_v42 }
 0x14f   :  { %v419_v45 = vpop.f32.mrf.mxu2  ;;  %566 = vst [vmem:[#allocation7 + $0x140] sm:$0xff] %v328_v44 }
 0x150   :  { %v511_v46 = vpop.f32.mrf.mxu3 }
 0x151   :  { %v512_v47 = vadd.f32 %v511_v46, %v419_v45 }
 0x153   :  { %567 = vst [vmem:[#allocation7 + $0x148] sm:$0xff] %v512_v47  ;;  %v238_v48 = vpop.f32.mrf.mxu0 }
 0x154   :  { %v330_v49 = vpop.f32.mrf.mxu1 }
 0x155   :  { %v331_v50 = vadd.f32 %v330_v49, %v238_v48 }
 0x157   :  { %v422_v51 = vpop.f32.mrf.mxu2  ;;  %568 = vst [vmem:[#allocation7 + $0x150] sm:$0xff] %v331_v50 }
 0x158   :  { %v514_v52 = vpop.f32.mrf.mxu3 }
 0x159   :  { %v515_v53 = vadd.f32 %v514_v52, %v422_v51 }
 0x15b   :  { %569 = vst [vmem:[#allocation7 + $0x158] sm:$0xff] %v515_v53  ;;  %v241_v54 = vpop.f32.mrf.mxu0 }
 0x15c   :  { %v333_v55 = vpop.f32.mrf.mxu1 }
 0x15d   :  { %v334_v56 = vadd.f32 %v333_v55, %v241_v54 }
 0x15f   :  { %v425_v57 = vpop.f32.mrf.mxu2  ;;  %570 = vst [vmem:[#allocation7 + $0x160] sm:$0xff] %v334_v56 }
 0x160   :  { %v517_v58 = vpop.f32.mrf.mxu3 }
 0x161   :  { %v518_v59 = vadd.f32 %v517_v58, %v425_v57 }
 0x163   :  { %571 = vst [vmem:[#allocation7 + $0x168] sm:$0xff] %v518_v59  ;;  %v244_v60 = vpop.f32.mrf.mxu0 }
 0x164   :  { %v336_v61 = vpop.f32.mrf.mxu1 }
 0x165   :  { %v337_v62 = vadd.f32 %v336_v61, %v244_v60 }
 0x167   :  { %v428_v63 = vpop.f32.mrf.mxu2  ;;  %572 = vst [vmem:[#allocation7 + $0x170] sm:$0xff] %v337_v62 }
 0x168   :  { %v520_v0 = vpop.f32.mrf.mxu3 }
 0x169   :  { %v521_v1 = vadd.f32 %v520_v0, %v428_v63 }
 0x16b   :  { %573 = vst [vmem:[#allocation7 + $0x178] sm:$0xff] %v521_v1  ;;  %v247_v2 = vpop.f32.mrf.mxu0 }
 0x16c   :  { %v339_v3 = vpop.f32.mrf.mxu1 }
 0x16d   :  { %v340_v4 = vadd.f32 %v339_v3, %v247_v2 }
 0x16f   :  { %v431_v5 = vpop.f32.mrf.mxu2  ;;  %574 = vst [vmem:[#allocation7 + $0x180] sm:$0xff] %v340_v4 }
 0x170   :  { %v523_v6 = vpop.f32.mrf.mxu3 }
 0x171   :  { %v524_v7 = vadd.f32 %v523_v6, %v431_v5 }
 0x173   :  { %575 = vst [vmem:[#allocation7 + $0x188] sm:$0xff] %v524_v7 }
 0x174   :  { %588 = dma.vmem_to_hbm [thread:$0]  %s581_s1, 6400, %s583_s23, [#allocation4], %s680_s17, %s680_s17, %s681_s18  }
 0x175   :  { %677 = dma.done.wait [#allocation4], 6400  }
 0x176   :  { %678 = vsyncadd [#allocation4], 4294960896 }
 0x177   :  { %593 = vsyncpa [#allocation3], 1 }
 0x178   :  { %594 = vsyncpa [#allocation6], 1 }
 0x179   :  { %595 = vsyncpa [#allocation4], 1 }

</bundles_post_ra>
